<compile_context>
chip_gen: v7x
topology: tpu7x:2x2x1
jax: 0.10.0
libtpu: 0.0.40
codegen_flags: <defaults>
</compile_context>

<pallas_src>
import functools

import jax
import jax.numpy as jnp
from jax.experimental import pallas as pl
from jax.experimental.pallas import tpu as pltpu


def _round_up(x, m):
    return ((x + m - 1) // m) * m


def _loss_kernel(ctx_ref, tgt_ref, whi_ref, wlo_ref, b_ref,
                 logits_ref, loss_ref, *, n_valid):
    """Per-tile: one-hot gather matmul -> logits tile; accumulate NLL sum."""
    i = pl.program_id(0)
    tile_n = ctx_ref.shape[0]
    vocab = whi_ref.shape[0]

    ids = ctx_ref[...]                                   # (tile_n, 1) int32
    tgts = tgt_ref[...]                                  # (tile_n, 1) int32

    col = jax.lax.broadcasted_iota(jnp.int32, (tile_n, vocab), 1)
    onehot = (col == ids).astype(jnp.bfloat16)           # exact 0/1 in bf16
    # Two bf16 MXU passes (hi + lo) reconstruct the f32 table rows to ~2^-16 rel err;
    # accumulation is f32. Each pass is an exact row gather of its bf16 table.
    logits = jnp.dot(onehot, whi_ref[...], preferred_element_type=jnp.float32)
    logits = logits + jnp.dot(onehot, wlo_ref[...], preferred_element_type=jnp.float32)
    logits = logits + b_ref[...]                         # (tile_n, vocab) f32
    logits_ref[...] = logits

    # Numerically stable cross entropy (f32), masked for padded rows of last tile.
    m = jnp.max(logits, axis=-1, keepdims=True)
    lse = jnp.log(jnp.sum(jnp.exp(logits - m), axis=-1, keepdims=True)) + m
    tgt_logit = jnp.sum(jnp.where(col == tgts, logits, 0.0), axis=-1, keepdims=True)
    row = jax.lax.broadcasted_iota(jnp.int32, (tile_n, 1), 0) + i * tile_n
    nll = jnp.where(row < n_valid, lse - tgt_logit, 0.0)

    @pl.when(i == 0)
    def _():
        loss_ref[...] = jnp.zeros_like(loss_ref)

    loss_ref[...] += jnp.sum(nll, keepdims=True)         # mean taken in the wrapper


def _logits_kernel(ctx_ref, whi_ref, wlo_ref, b_ref, logits_ref):
    """Loss-free variant (target is None): logits only, no exp/LSE, no target DMA."""
    tile_n = ctx_ref.shape[0]
    vocab = whi_ref.shape[0]
    ids = ctx_ref[...]
    col = jax.lax.broadcasted_iota(jnp.int32, (tile_n, vocab), 1)
    onehot = (col == ids).astype(jnp.bfloat16)
    logits = jnp.dot(onehot, whi_ref[...], preferred_element_type=jnp.float32)
    logits = logits + jnp.dot(onehot, wlo_ref[...], preferred_element_type=jnp.float32)
    logits_ref[...] = logits + b_ref[...]


@functools.partial(jax.jit, static_argnames=("compute_loss",))
def bigram_forward(context, target, emb_table, lm_w, lm_b, *, compute_loss=True):
    """Mirrors BigramLanguageModel.forward.

    context, target: (B, T) int32 (target may be None when compute_loss=False)
    emb_table:       (vocab, n_embd) f32   (nn.Embedding weight)
    lm_w:            (vocab, n_embd) f32   (nn.Linear weight, PyTorch layout)
    lm_b:            (vocab,)        f32   (nn.Linear bias)
    """
    B, T = context.shape
    vocab, n_embd = emb_table.shape
    N = B * T

    # Fuse the two linear maps once per call (XLA, outside the kernel):
    #   emb_table[ctx] @ lm_w.T + b  ==  onehot(ctx) @ (emb_table @ lm_w.T) + b
    # The fused (vocab, vocab) table is split into a bf16 hi/lo pair for the kernel.
    # TODO(synk): for very large vocab the (vocab, vocab) resident table would not fit
    # VMEM; a column-tiled variant with online LSE would be needed there.
    w_big = jnp.einsum("ve,ce->vc", emb_table, lm_w,
                       precision=jax.lax.Precision.HIGHEST,
                       preferred_element_type=jnp.float32)
    w_hi = w_big.astype(jnp.bfloat16)
    w_lo = (w_big - w_hi.astype(jnp.float32)).astype(jnp.bfloat16)
    bias = lm_b.reshape(1, vocab).astype(jnp.float32)

    # Tile over N; keep the logits-tile footprint small vs v7x's 64 MiB VMEM.
    max_tile = max(8, min(1024, _round_up((2 * 1024 * 1024) // (vocab * 4), 8)))
    tile_n = min(_round_up(N, 8), max_tile)
    n_pad = _round_up(N, tile_n)
    num_tiles = n_pad // tile_n

    ctx_flat = jnp.pad(context.reshape(N).astype(jnp.int32),
                       (0, n_pad - N)).reshape(n_pad, 1)

    id_spec = pl.BlockSpec((tile_n, 1), lambda i: (i, 0))
    wtab_spec = pl.BlockSpec((vocab, vocab), lambda i: (0, 0))     # resident
    bias_spec = pl.BlockSpec((1, vocab), lambda i: (0, 0))         # resident
    logits_spec = pl.BlockSpec((tile_n, vocab), lambda i: (i, 0))  # lane-dense store

    # Explicit VMEM budget: double-buffered tiles + resident fused tables, with headroom.
    vmem_est = (2 * tile_n * vocab * 4          # logits tiles (f32, 2 buffers)
                + 2 * 2 * tile_n * 128 * 4      # ctx/tgt blocks (lane-padded, 2 buffers)
                + 2 * vocab * vocab * 2         # w_hi + w_lo (bf16, resident)
                + vocab * 4)                    # bias
    vmem_limit = int(min(max(4 * vmem_est, 16 * 1024 * 1024), 48 * 1024 * 1024))

    if compute_loss:
        tgt_flat = jnp.pad(target.reshape(N).astype(jnp.int32),
                           (0, n_pad - N)).reshape(n_pad, 1)
        logits_pad, loss_sum = pl.pallas_call(
            functools.partial(_loss_kernel, n_valid=N),
            grid=(num_tiles,),
            in_specs=[id_spec, id_spec, wtab_spec, wtab_spec, bias_spec],
            out_specs=(logits_spec, pl.BlockSpec((1, 1), lambda i: (0, 0))),
            out_shape=(jax.ShapeDtypeStruct((n_pad, vocab), jnp.float32),
                       jax.ShapeDtypeStruct((1, 1), jnp.float32)),
            compiler_params=pltpu.CompilerParams(
                dimension_semantics=("arbitrary",),   # loss accumulator across N tiles
                vmem_limit_bytes=vmem_limit),
        )(ctx_flat, tgt_flat, w_hi, w_lo, bias)
        logits = logits_pad[:N]                       # (B*T, vocab): PyTorch with-target layout
        loss = loss_sum[0, 0] / jnp.float32(N)
        return logits, loss

    logits_pad = pl.pallas_call(
        _logits_kernel,
        grid=(num_tiles,),
        in_specs=[id_spec, wtab_spec, wtab_spec, bias_spec],
        out_specs=logits_spec,
        out_shape=jax.ShapeDtypeStruct((n_pad, vocab), jnp.float32),
        compiler_params=pltpu.CompilerParams(
            dimension_semantics=("parallel",),        # independent tiles (megacore)
            vmem_limit_bytes=vmem_limit),
    )(ctx_flat, w_hi, w_lo, bias)
    # PyTorch path with target=None: logits stay (B, T, vocab), loss is None.
    return logits_pad[:N].reshape(B, T, vocab), None


if __name__ == "__main__":
    # Small, deterministic setup.
    B, T = 2, 8
    vocab_size, n_embd = 128, 32

    key = jax.random.PRNGKey(0)
    k_emb, k_w, k_b, k_ctx, k_tgt = jax.random.split(key, 5)

    # nn.Embedding init ~ N(0, 1); nn.Linear init ~ U(-1/sqrt(fan_in), +...)
    emb_table = jax.random.normal(k_emb, (vocab_size, n_embd), jnp.float32)
    bound = 1.0 / (n_embd ** 0.5)
    lm_w = jax.random.uniform(k_w, (vocab_size, n_embd), jnp.float32, -bound, bound)
    lm_b = jax.random.uniform(k_b, (vocab_size,), jnp.float32, -bound, bound)

    context = jax.random.randint(k_ctx, (B, T), 0, vocab_size, jnp.int32)
    target = jax.random.randint(k_tgt, (B, T), 0, vocab_size, jnp.int32)

    # Forward with targets (returns (B*T, vocab) logits and scalar loss).
    logits, loss = bigram_forward(context, target, emb_table, lm_w, lm_b,
                                  compute_loss=True)
    jax.block_until_ready((logits, loss))

    # Forward without targets (returns (B, T, vocab) logits, loss=None).
    logits_nt, loss_nt = bigram_forward(context, None, emb_table, lm_w, lm_b,
                                        compute_loss=False)
    jax.block_until_ready(logits_nt)

    # ---- Reference checks -------------------------------------------------
    ids = context.reshape(-1)
    tgt_ids = target.reshape(-1)
    ref_f32 = (emb_table @ lm_w.T)[ids] + lm_b            # full-f32 PyTorch-equivalent logits

    def xent(lg):
        lse = jax.scipy.special.logsumexp(lg, axis=-1)
        return jnp.mean(lse - lg[jnp.arange(B * T), tgt_ids])

    assert logits.shape == (B * T, vocab_size)
    assert logits_nt.shape == (B, T, vocab_size) and loss_nt is None
    # Both kernel variants must agree exactly (identical hi/lo gather path).
    assert jnp.allclose(logits_nt.reshape(B * T, vocab_size), logits,
                        atol=1e-6, rtol=1e-6)
    # In-kernel cross entropy must match a reference CE of the kernel's own logits.
    assert jnp.allclose(loss, xent(logits), atol=1e-4, rtol=1e-4)
    # hi/lo bf16 split recovers f32 accuracy to ~2^-16 relative error.
    assert jnp.allclose(logits, ref_f32, atol=1e-3, rtol=1e-3)
    assert jnp.allclose(loss, xent(ref_f32), atol=1e-3, rtol=1e-3)

    print("KERNEL_OK")
</pallas_src>

<mosaic_0001>
module attributes {stable_mosaic.version = 11 : i64} {
  func.func @_loss_kernel(%arg0: i32, %arg1: memref<16x1xi32, #tpu.memory_space<vmem>>, %arg2: memref<16x1xi32, #tpu.memory_space<vmem>>, %arg3: memref<128x128xbf16, #tpu.memory_space<vmem>>, %arg4: memref<128x128xbf16, #tpu.memory_space<vmem>>, %arg5: memref<1x128xf32, #tpu.memory_space<vmem>>, %arg6: memref<16x128xf32, #tpu.memory_space<vmem>>, %arg7: memref<1x1xf32, #tpu.memory_space<vmem>>) attributes {dimension_semantics = [#tpu.dimension_semantics<arbitrary>], iteration_bounds = array<i64: 1>, scalar_prefetch = 0 : i64, scratch_operands = 0 : i64, tpu.core_type = #tpu.core_type<tc>, window_params = [{transform_indices = @transform_0, window_bounds = array<i64: 16, 1>}, {transform_indices = @transform_1, window_bounds = array<i64: 16, 1>}, {pipeline_mode = #tpu.pipeline_mode<synchronous>, transform_indices = @transform_2, window_bounds = array<i64: 128, 128>}, {pipeline_mode = #tpu.pipeline_mode<synchronous>, transform_indices = @transform_3, window_bounds = array<i64: 128, 128>}, {pipeline_mode = #tpu.pipeline_mode<synchronous>, transform_indices = @transform_4, window_bounds = array<i64: 1, 128>}, {transform_indices = @transform_5, window_bounds = array<i64: 16, 128>}, {pipeline_mode = #tpu.pipeline_mode<synchronous>, transform_indices = @transform_6, window_bounds = array<i64: 1, 1>}]} {
    %c0 = arith.constant 0 : index
    %c0_0 = arith.constant 0 : index
    %0 = vector.load %arg1[%c0, %c0_0] : memref<16x1xi32, #tpu.memory_space<vmem>>, vector<16x1xi32>
    %c0_1 = arith.constant 0 : index
    %c0_2 = arith.constant 0 : index
    %1 = vector.load %arg2[%c0_1, %c0_2] : memref<16x1xi32, #tpu.memory_space<vmem>>, vector<16x1xi32>
    %2 = tpu.iota {dimensions = array<i32: 1>} : vector<16x128xi32>
    %3 = vector.broadcast %0 : vector<16x1xi32> to vector<16x128xi32>
    %4 = arith.cmpi eq, %2, %3 : vector<16x128xi32>
    %5 = arith.extui %4 : vector<16x128xi1> to vector<16x128xi32>
    %6 = arith.sitofp %5 : vector<16x128xi32> to vector<16x128xf32>
    %7 = arith.truncf %6 : vector<16x128xf32> to vector<16x128xbf16>
    %c0_3 = arith.constant 0 : index
    %c0_4 = arith.constant 0 : index
    %8 = vector.load %arg3[%c0_3, %c0_4] : memref<128x128xbf16, #tpu.memory_space<vmem>>, vector<128x128xbf16>
    %cst = arith.constant dense<0.000000e+00> : vector<16x128xf32>
    %9 = tpu.matmul %7, %8, %cst {dimension_numbers = #tpu.dot_dimension_numbers<[1], [0], [0], [1], [0, 0, 1, 1], [], []>} : vector<16x128xbf16>, vector<128x128xbf16>, vector<16x128xf32> -> vector<16x128xf32>
    %c0_5 = arith.constant 0 : index
    %c0_6 = arith.constant 0 : index
    %10 = vector.load %arg4[%c0_5, %c0_6] : memref<128x128xbf16, #tpu.memory_space<vmem>>, vector<128x128xbf16>
    %cst_7 = arith.constant dense<0.000000e+00> : vector<16x128xf32>
    %11 = tpu.matmul %7, %10, %cst_7 {dimension_numbers = #tpu.dot_dimension_numbers<[1], [0], [0], [1], [0, 0, 1, 1], [], []>} : vector<16x128xbf16>, vector<128x128xbf16>, vector<16x128xf32> -> vector<16x128xf32>
    %12 = arith.addf %9, %11 : vector<16x128xf32>
    %c0_8 = arith.constant 0 : index
    %c0_9 = arith.constant 0 : index
    %13 = vector.load %arg5[%c0_8, %c0_9] : memref<1x128xf32, #tpu.memory_space<vmem>>, vector<1x128xf32>
    %14 = vector.broadcast %13 : vector<1x128xf32> to vector<16x128xf32>
    %15 = arith.addf %12, %14 : vector<16x128xf32>
    %c0_10 = arith.constant 0 : index
    %c0_11 = arith.constant 0 : index
    %16 = vector.load %arg6[%c0_10, %c0_11] : memref<16x128xf32, #tpu.memory_space<vmem>>, vector<16x128xf32>
    tpu.vector_store %arg6[%c0_10, %c0_11], %15 {strides = array<i32>} : memref<16x128xf32, #tpu.memory_space<vmem>>, vector<16x128xf32>,
    %cst_12 = arith.constant dense<0xFF800000> : vector<16xf32>
    %17 = vector.multi_reduction <maximumf>, %15, %cst_12 [1] : vector<16x128xf32> to vector<16xf32>
    %18 = vector.shape_cast %17 : vector<16xf32> to vector<16x1xf32>
    %19 = vector.broadcast %18 : vector<16x1xf32> to vector<16x128xf32>
    %20 = arith.subf %15, %19 : vector<16x128xf32>
    %21 = math.exp %20 : vector<16x128xf32>
    %cst_13 = arith.constant dense<0.000000e+00> : vector<16xf32>
    %22 = vector.multi_reduction <add>, %21, %cst_13 [1] : vector<16x128xf32> to vector<16xf32>
    %23 = vector.shape_cast %22 : vector<16xf32> to vector<16x1xf32>
    %24 = math.log %23 : vector<16x1xf32>
    %25 = arith.addf %24, %18 : vector<16x1xf32>
    %26 = vector.broadcast %1 : vector<16x1xi32> to vector<16x128xi32>
    %27 = arith.cmpi eq, %2, %26 : vector<16x128xi32>
    %cst_14 = arith.constant 0.000000e+00 : f32
    %28 = vector.broadcast %cst_14 : f32 to vector<16x128xf32>
    %29 = arith.select %27, %15, %28 : vector<16x128xi1>, vector<16x128xf32>
    %cst_15 = arith.constant dense<0.000000e+00> : vector<16xf32>
    %30 = vector.multi_reduction <add>, %29, %cst_15 [1] : vector<16x128xf32> to vector<16xf32>
    %31 = vector.shape_cast %30 : vector<16xf32> to vector<16x1xf32>
    %32 = tpu.iota {dimensions = array<i32: 0>} : vector<16x1xi32>
    %c16_i32 = arith.constant 16 : i32
    %33 = arith.muli %arg0, %c16_i32 : i32
    %34 = vector.broadcast %33 : i32 to vector<16x1xi32>
    %35 = arith.addi %32, %34 : vector<16x1xi32>
    %c16_i32_16 = arith.constant 16 : i32
    %36 = vector.broadcast %c16_i32_16 : i32 to vector<16x1xi32>
    %37 = arith.cmpi slt, %35, %36 : vector<16x1xi32>
    %38 = arith.subf %25, %31 : vector<16x1xf32>
    %cst_17 = arith.constant 0.000000e+00 : f32
    %39 = vector.broadcast %cst_17 : f32 to vector<16x1xf32>
    %40 = arith.select %37, %38, %39 : vector<16x1xi1>, vector<16x1xf32>
    %c0_i32 = arith.constant 0 : i32
    %41 = arith.cmpi eq, %arg0, %c0_i32 : i32
    %42 = arith.extui %41 : i1 to i32
    %c0_i32_18 = arith.constant 0 : i32
    %43 = arith.cmpi ne, %42, %c0_i32_18 : i32
    scf.if %43 {
      %cst_24 = arith.constant 0.000000e+00 : f32
      %52 = vector.broadcast %cst_24 : f32 to vector<1x1xf32>
      %c0_25 = arith.constant 0 : index
      %c0_26 = arith.constant 0 : index
      %53 = vector.load %arg7[%c0_25, %c0_26] : memref<1x1xf32, #tpu.memory_space<vmem>>, vector<1x1xf32>
      tpu.vector_store %arg7[%c0_25, %c0_26], %52 {strides = array<i32>} : memref<1x1xf32, #tpu.memory_space<vmem>>, vector<1x1xf32>,
    } else {
    }
    %c0_19 = arith.constant 0 : index
    %c0_20 = arith.constant 0 : index
    %44 = vector.load %arg7[%c0_19, %c0_20] : memref<1x1xf32, #tpu.memory_space<vmem>>, vector<1x1xf32>
    %45 = vector.shape_cast %40 : vector<16x1xf32> to vector<1x16x1xf32>
    %cst_21 = arith.constant dense<0.000000e+00> : vector<1xf32>
    %46 = vector.multi_reduction <add>, %45, %cst_21 [1, 2] : vector<1x16x1xf32> to vector<1xf32>
    %47 = vector.shape_cast %46 : vector<1xf32> to vector<1x1x1xf32>
    %48 = vector.extract %47[0, 0, 0] : f32 from vector<1x1x1xf32>
    %49 = vector.broadcast %48 : f32 to vector<1x1xf32>
    %50 = arith.addf %44, %49 : vector<1x1xf32>
    %c0_22 = arith.constant 0 : index
    %c0_23 = arith.constant 0 : index
    %51 = vector.load %arg7[%c0_22, %c0_23] : memref<1x1xf32, #tpu.memory_space<vmem>>, vector<1x1xf32>
    tpu.vector_store %arg7[%c0_22, %c0_23], %50 {strides = array<i32>} : memref<1x1xf32, #tpu.memory_space<vmem>>, vector<1x1xf32>,
    return
  }
  func.func @transform_0(%arg0: i32) -> (i32, i32) {
    %c0_i32 = arith.constant 0 : i32
    %c0_i32_0 = arith.constant 0 : i32
    return %arg0, %c0_i32 : i32, i32
  }
  func.func @transform_1(%arg0: i32) -> (i32, i32) {
    %c0_i32 = arith.constant 0 : i32
    %c0_i32_0 = arith.constant 0 : i32
    return %arg0, %c0_i32 : i32, i32
  }
  func.func @transform_2(%arg0: i32) -> (i32, i32) {
    %c0_i32 = arith.constant 0 : i32
    %c0_i32_0 = arith.constant 0 : i32
    %c0_i32_1 = arith.constant 0 : i32
    return %c0_i32, %c0_i32_0 : i32, i32
  }
  func.func @transform_3(%arg0: i32) -> (i32, i32) {
    %c0_i32 = arith.constant 0 : i32
    %c0_i32_0 = arith.constant 0 : i32
    %c0_i32_1 = arith.constant 0 : i32
    return %c0_i32, %c0_i32_0 : i32, i32
  }
  func.func @transform_4(%arg0: i32) -> (i32, i32) {
    %c0_i32 = arith.constant 0 : i32
    %c0_i32_0 = arith.constant 0 : i32
    %c0_i32_1 = arith.constant 0 : i32
    return %c0_i32, %c0_i32_0 : i32, i32
  }
  func.func @transform_5(%arg0: i32) -> (i32, i32) {
    %c0_i32 = arith.constant 0 : i32
    %c0_i32_0 = arith.constant 0 : i32
    return %arg0, %c0_i32 : i32, i32
  }
  func.func @transform_6(%arg0: i32) -> (i32, i32) {
    %c0_i32 = arith.constant 0 : i32
    %c0_i32_0 = arith.constant 0 : i32
    %c0_i32_1 = arith.constant 0 : i32
    return %c0_i32, %c0_i32_0 : i32, i32
  }
}

</mosaic_0001>

<bundles_post_ra>
// kernel: bigram_forward.1
= control target key start
LH: loop header
LB: loop body
LE: loop exit
PB: predicated region body
PF: predicated region fallthrough
CT: control target
= control target key end

     0   :  { %12 = vsyncpa [#allocation3], 0  ;;  %v531_v1 = vmov 0   ;;  %v532_v3 = vmov 0.0   ;;  %vm533_vm0 = vmmov 0   ;;  %s682_s0 = inlined_call_operand.vmem [shape: s32[16,1], index: 0, kind: input, shape index: {}]   ;;  %s683_s1 = inlined_call_operand.vmem [shape: s32[16,1], index: 1, kind: input, shape index: {}]   ;;  %s684_s2 = inlined_call_operand.vmem [shape: bf16[128,128], index: 2, kind: input, shape index: {}]   ;;  %s685_s3 = inlined_call_operand.vmem [shape: bf16[128,128], index: 3, kind: input, shape index: {}]   ;;  %s686_s4 = inlined_call_operand.vmem [shape: f32[1,128], index: 4, kind: input, shape index: {}]   ;;  %s687_s5 = inlined_call_operand.hbm [shape: f32[16,128], index: 5, kind: output, shape index: {0}]   ;;  %s688_s6 = inlined_call_operand.hbm [shape: f32[1,1], index: 6, kind: output, shape index: {1}]  }
   0x1   :  { %v25_v0 = vld [vmem:[%s682_s0] sm:$0xff]  ;;  %457 = vset.pattern.permute.xlu0 %v531_v1  ;;  %v26_v2 = vld [vmem:[%s682_s0 + $0x8] sm:$0xff]  ;;  %407 = vmatprep.subr.bf16.mxu0 %v532_v3  ;;  %v463_v9 = vld [vmem:[%s685_s3 + $0x10] sm:$0xff]  }
   0x2   :  { %v459_v4 = vld [vmem:[%s685_s3] sm:$0xff]   ;;  %32 = vperm.xlu0 %457, %v25_v0   ;;  %427 = vmatprep.subr.bf16.mxu1 %v532_v3  ;;  %v461_v6 = vld [vmem:[%s685_s3 + $0x8] sm:$0xff]   ;;  %v464_v10 = vld [vmem:[%s684_s2 + $0x10] sm:$0xff]  }
   0x3   :  { %v460_v5 = vld [vmem:[%s684_s2] sm:$0xff]   ;;  %408 = vmatpush3.bf16.msra.mxu0 %v459_v4  ;;  %458 = vset.pattern.permute.xlu1 %v531_v1  ;;  %v462_v7 = vld [vmem:[%s684_s2 + $0x8] sm:$0xff]   ;;  %v465_v11 = vld [vmem:[%s685_s3 + $0x18] sm:$0xff]  }
   0x4   :  { %428 = vmatpush3.bf16.msra.mxu1 %v460_v5  ;;  %409 = vmatprep.subr.bf16.mxu0 %v532_v3  ;;  %v27_v8 = vld [vmem:[%s683_s1] sm:$0xff]  ;;  %v466_v12 = vld [vmem:[%s684_s2 + $0x18] sm:$0xff]  }
   0x5   :  { %429 = vmatprep.subr.bf16.mxu1 %v532_v3  ;;  %423 = vmatprep.mubr.msk.bf16.mxu0 %vm533_vm0, %v532_v3  ;;  %v467_v13 = vld [vmem:[%s685_s3 + $0x20] sm:$0xff]  }
   0x6   :  { %35 = vperm.xlu0 %457, %v26_v2   ;;  %443 = vmatprep.mubr.msk.bf16.mxu1 %vm533_vm0, %v532_v3  ;;  %v468_v14 = vld [vmem:[%s684_s2 + $0x20] sm:$0xff]  }
   0x7   :  { %410 = vmatpush3.bf16.msra.mxu0 %v461_v6 }
   0x8   :  { %430 = vmatpush3.bf16.msra.mxu1 %v462_v7  ;;  %411 = vmatprep.subr.bf16.mxu0 %v532_v3 }
   0x9   :  { %431 = vmatprep.subr.bf16.mxu1 %v532_v3 }
   0xa   :  { %286 = vperm.xlu0 %457, %v27_v8  }
   0xb   :  { %412 = vmatpush3.bf16.msra.mxu0 %v463_v9 }
   0xc   :  { %432 = vmatpush3.bf16.msra.mxu1 %v464_v10  ;;  %413 = vmatprep.subr.bf16.mxu0 %v532_v3 }
   0xd   :  { %433 = vmatprep.subr.bf16.mxu1 %v532_v3 }
   0xf   :  { %414 = vmatpush3.bf16.msra.mxu0 %v465_v11 }
  0x10   :  { %434 = vmatpush3.bf16.msra.mxu1 %v466_v12  ;;  %415 = vmatprep.subr.bf16.mxu0 %v532_v3 }
  0x11   :  { %435 = vmatprep.subr.bf16.mxu1 %v532_v3 }
  0x12   :  { %13 = vsyncpa [#allocation5], 0  ;;  %v469_v15 = vld [vmem:[%s685_s3 + $0x28] sm:$0xff]   ;;  %v471_v17 = vld [vmem:[%s685_s3 + $0x30] sm:$0xff]   ;;  %v29_v21 = vlaneseq  ;;  %v534_v25 = vmov 1.0|1.0  }
  0x13   :  { %416 = vmatpush3.bf16.msra.mxu0 %v467_v13  ;;  %v470_v16 = vld [vmem:[%s684_s2 + $0x28] sm:$0xff]   ;;  %v472_v18 = vld [vmem:[%s684_s2 + $0x30] sm:$0xff]   ;;  %v473_v19 = vld [vmem:[%s685_s3 + $0x38] sm:$0xff]   ;;  %vm319_vm6 = vcmask 7168   ;;  %vm316_vm7 = vcmask 0  }
  0x14   :  { %436 = vmatpush3.bf16.msra.mxu1 %v468_v14  ;;  %417 = vmatprep.subr.bf16.mxu0 %v532_v3  ;;  %v474_v20 = vld [vmem:[%s684_s2 + $0x38] sm:$0xff]   ;;  %v30_v23 = vand.u32 127, %v29_v21  ;;  %v388_v28 = vld [vmem:[%s686_s4] ss:$0 sm:$0xff]  ;;  %v28_v39 = vld [vmem:[%s683_s1 + $0x8] sm:$0xff]  ;;  %s535_s1 = smov [#allocation2]  }
  0x15   :  { %437 = vmatprep.subr.bf16.mxu1 %v532_v3  ;;  %317 = vst.msk [vmem:[#allocation4] sm:$0x1] %vm316_vm7, %v532_v3  ;;  %s341_s4 = sshll.u32 %s535_s1, 4  ;;  %s342_s4 = int_to_ptr.vmem [resolvable:$true] %s341_s4 }
  0x16   :  { %s483_s11 = scalar_lea.vmem %s342_s4, 256  ;;  %p488_p1 = scmp.lt.s32.totalorder %s342_s4, %s342_s4 }
  0x17   :  { %418 = vmatpush3.bf16.msra.mxu0 %v469_v15  ;;  %p484_p0 = scmp.ne.s32.totalorder %s342_s4, %s483_s11  ;;  %p489_p2 = scmp.lt.s32.totalorder %s483_s11, %s483_s11 }
  0x18   :  { %438 = vmatpush3.bf16.msra.mxu1 %v470_v16  ;;  %419 = vmatprep.subr.bf16.mxu0 %v532_v3 }
  0x19   :  { %439 = vmatprep.subr.bf16.mxu1 %v532_v3  ;;  %p490_p3 = por %p489_p2, %p488_p1 }
  0x1b   :  { %420 = vmatpush3.bf16.msra.mxu0 %v471_v17  ;;  %p491_p4 = pnand %p490_p3, %p484_p0 }
  0x1c   :  { %440 = vmatpush3.bf16.msra.mxu1 %v472_v18  ;;  %421 = vmatprep.subr.bf16.mxu0 %v532_v3 }
  0x1d   :  { %441 = vmatprep.subr.bf16.mxu1 %v532_v3 }
  0x1f   :  { %422 = vmatpush3.bf16.msra.mxu0 %v473_v19 }
  0x20   :  { %442 = vmatpush3.bf16.msra.mxu1 %v474_v20 }
  0x81   :  { %v33_v22 = vpop.permute.xlu0 %32 }
  0x82   :  { %vm37_vm1 = vcmp.eq.s32.totalorder %v30_v23, %v33_v22 }
  0x85   :  { %v36_v24 = vpop.permute.xlu0 %35 }
  0x86   :  { %vm38_vm2 = vcmp.eq.s32.totalorder %v30_v23, %v36_v24 }
  0x87   :  { %vm376_vm3 = vmpackc.low %vm38_vm2, %vm37_vm1 }
  0x88   :  { %424 = vmatmul.mubr.msk.bf16.vlgmr.msra.gmra.mrb[0].mxu0 %vm376_vm3, %v534_v25  ;;  %444 = vmatmul.mubr.msk.bf16.vlgmr.msra.gmra.mrb[0].mxu1 %vm376_vm3, %v534_v25 }
  0x89   :  { %v287_v47 = vpop.permute.xlu0 %286 }
  0x8a   :  { %vm291_vm4 = vcmp.eq.s32.totalorder %v30_v23, %v287_v47 }
 0x15b   :  { %v158_v26 = vpop.f32.mrb[0].mxu0  ;;  %v247_v27 = vpop.f32.mrb[0].mxu1 }
 0x15c   :  { %v248_v29 = vadd.f32 %v247_v27, %v158_v26  ;;  %v425_v30 = vpop.f32.mrb[1].mxu0  ;;  %v445_v31 = vpop.f32.mrb[1].mxu1 }
 0x15d   :  { %v161_v32 = vpop.f32.mrb[2].mxu0  ;;  %v250_v33 = vpop.f32.mrb[2].mxu1 }
 0x15e   :  { %v261_v34 = vadd.f32 %v388_v28, %v248_v29  ;;  %v251_v35 = vadd.f32 %v250_v33, %v161_v32  ;;  %v426_v36 = vpop.f32.mrb[3].mxu0  ;;  %v446_v37 = vpop.f32.mrb[3].mxu1 }
 0x160   :  { %263 = vst [vmem:[#allocation2] sm:$0xff] %v261_v34  ;;  %v262_v38 = vadd.f32 %v388_v28, %v251_v35  ;;  %265 = vmax.xlane.f32.xlu1 %v261_v34  ;;  %v293_v50 = vsel %vm291_vm4, %v261_v34, 0.0 }
 0x162   :  { %264 = vst [vmem:[#allocation2 + $0x8] sm:$0xff] %v262_v38 }
 0x164   :  { %267 = vmax.xlane.f32.xlu1 %v262_v38 }
 0x175   :  { %289 = vperm.xlu1 %458, %v28_v39  }
 0x1ed   :  { %v266_v40 = vpop.xlane.xlu1 %265 }
 0x1ee   :  { %v269_v41 = vsub.f32 %v261_v34, %v266_v40 }
 0x1f0   :  { %v271_v42 = vmul.f32 1.442695, %v269_v41 }
 0x1f1   :  { %v268_v43 = vpop.xlane.xlu1 %267 }
 0x1f2   :  { %475 = vpow2.f32 %v271_v42  ;;  %v270_v44 = vsub.f32 %v262_v38, %v268_v43 }
 0x1f4   :  { %v273_v45 = vmul.f32 1.442695, %v270_v44 }
 0x1f5   :  { %v290_v48 = vpop.permute.xlu1 %289 }
 0x1f6   :  { %477 = vpow2.f32 %v273_v45  ;;  %vm292_vm5 = vcmp.eq.s32.totalorder %v30_v23, %v290_v48 }
 0x1f7   :  { %v294_v51 = vsel %vm292_vm5, %v262_v38, 0.0 }
 0x1fc   :  { %v476_v46 = vpop.eup %475 }
 0x1fd   :  { %275 = vadd.xlane.f32.xlu0 %v476_v46 }
 0x200   :  { %v478_v49 = vpop.eup %477 }
 0x201   :  { %277 = vadd.xlane.f32.xlu1 %v478_v49  ;;  %295 = vadd.xlane.f32.xlu0 %v293_v50 }
 0x205   :  { %297 = vadd.xlane.f32.xlu0 %v294_v51 }
 0x28a   :  { %v276_v52 = vpop.xlane.xlu0 %275 }
 0x28b   :  { %479 = vlog2.f32 %v276_v52 }
 0x28e   :  { %v278_v53 = vpop.xlane.xlu1 %277  ;;  %v296_v56 = vpop.xlane.xlu0 %295 }
 0x28f   :  { %481 = vlog2.f32 %v278_v53 }
 0x292   :  { %v298_v62 = vpop.xlane.xlu0 %297 }
 0x295   :  { %v480_v54 = vpop.eup %479 }
 0x296   :  { %v280_v55 = vmul.f32 0.6931472, %v480_v54 }
 0x298   :  { %v283_v57 = vadd.f32 %v280_v55, %v266_v40 }
 0x299   :  { %v482_v58 = vpop.eup %481 }
 0x29a   :  { %v282_v59 = vmul.f32 0.6931472, %v482_v58  ;;  %v308_v60 = vsub.f32 %v283_v57, %v296_v56 }
 0x29c   :  { %v284_v61 = vadd.f32 %v282_v59, %v268_v43  ;;  %v320_v0 = vsel %vm319_vm6, %v308_v60, 0.0 }
 0x29e   :  { %v309_v63 = vsub.f32 %v284_v61, %v298_v62 }
 0x2a0   :  { %v321_v1 = vsel %vm319_vm6, %v309_v63, 0.0 }
 0x2a1   :  { %v322_v2 = vadd.f32 %v321_v1, %v320_v0 }
 0x2a3   :  { %323 = vadd.xlane.f32.xlu0 %v322_v2 }
 0x2a4   :  { %494 = shalt.err (!%p491_p4)
}
 0x2a5   :  { %s495_s14 = scalar_lea.hbm %s687_s5, 256 }
 0x2a6   :  { %p496_p5 = scmp.ne.s32.totalorder %s687_s5, %s495_s14  ;;  %p499_p6 = scmp.lt.u32.totalorder %s495_s14, %s687_s5 }
 0x2a8   :  { %p501_p7 = pnand %p499_p6, %p496_p5 }
 0x2aa   :  { %504 = shalt.err (!%p501_p7)
}
 0x2ab   :  { %s536_s19 = smov 128   ;;  %s537_s20 = smov 8   ;;  %v318_v10 = vld [vmem:[#allocation4] sm:$0x1] }
 0x2ac   :  { %347 = dma.vmem_to_hbm [thread:$0]  %s342_s4, 256, %s687_s5, [#allocation3], %s536_s19, %s536_s19, %s537_s20  }
 0x2ad   :  { %s538_s23 = smov [#allocation4]  }
 0x2ae   :  { %s354_s24 = sshll.u32 %s538_s23, 4  ;;  %s355_s24 = int_to_ptr.vmem [resolvable:$true] %s354_s24 }
 0x2af   :  { %s505_s26 = scalar_lea.vmem %s355_s24, 16  ;;  %s509_s5 = scalar_lea.vmem %s355_s24, 32 }
 0x2b0   :  { %p506_p8 = scmp.ne.s32.totalorder %s355_s24, %s505_s26  ;;  %p510_p9 = scmp.lt.s32.totalorder %s355_s24, %s355_s24 }
 0x2b1   :  { %p511_p10 = scmp.lt.s32.totalorder %s509_s5, %s505_s26 }
 0x2b3   :  { %p512_p11 = por %p511_p10, %p510_p9 }
 0x2b5   :  { %p513_p12 = pnand %p512_p11, %p506_p8 }
 0x330   :  { %v324_v3 = vpop.xlane.xlu0 %323 }
 0x331   :  { %v325_v4 = vrot.slane %v324_v3, 4 }
 0x333   :  { %v326_v5 = vadd.f32 %v325_v4, %v324_v3 }
 0x335   :  { %v327_v6 = vrot.slane %v326_v5, 2 }
 0x337   :  { %v328_v7 = vadd.f32 %v327_v6, %v326_v5 }
 0x339   :  { %v329_v8 = vrot.slane %v328_v7, 1 }
 0x33b   :  { %v330_v9 = vadd.f32 %v329_v8, %v328_v7 }
 0x33d   :  { %447 = vpush %v330_v9 }
 0x36e   :  { %s448_s25 = spop %447 }
 0x36f   :  { %v332_v11 = vstv %s448_s25 }
 0x370   :  { %v333_v12 = vadd.f32 %v332_v11, %v318_v10 }
 0x372   :  { %335 = vst.msk [vmem:[#allocation4] sm:$0x1] %vm316_vm7, %v333_v12 }
 0x373   :  { %516 = shalt.err (!%p513_p12)
}
 0x374   :  { %s517_s29 = scalar_lea.hbm %s688_s6, 16 }
 0x375   :  { %p518_p13 = scmp.ne.s32.totalorder %s688_s6, %s517_s29  ;;  %p521_p0 = scmp.lt.u32.totalorder %s517_s29, %s688_s6 }
 0x377   :  { %p523_p1 = pnand %p521_p0, %p518_p13 }
 0x379   :  { %526 = shalt.err (!%p523_p1)
}
 0x37a   :  { %357 = dma.vmem_to_hbm [thread:$0]  %s355_s24, 16, %s688_s6, [#allocation5]  }
 0x37b   :  { %527 = dma.done.wait [#allocation3], 256  }
 0x37c   :  { %528 = vsyncadd [#allocation3], 4294967040 }
 0x37d   :  { %529 = dma.done.wait [#allocation5], 16  }
 0x37e   :  { %530 = vsyncadd [#allocation5], 4294967280 }
 0x37f   :  { %364 = vsyncpa [#allocation3], 1 }
 0x380   :  { %365 = vsyncpa [#allocation5], 1 }

</bundles_post_ra>
